<compile_context>
chip_gen: v6e
topology: v6e:2x2x1
jax: 0.10.0
libtpu: 0.0.40
codegen_flags: <defaults>
</compile_context>

<pallas_src>
import functools
from dataclasses import dataclass

import jax
import jax.numpy as jnp
from jax.experimental import pallas as pl
from jax.experimental.pallas import tpu as pltpu

_LANE = 128
_SUBLANE = 8
_MAX_LANE_WIDTH = 2048  # cap for the lane-dense flattened last dim


def _vmem_capacity_bytes() -> int:
    """Physical VMEM of the attached TPU; conservative fallback if unknown."""
    try:
        info = pltpu.get_tpu_info()
        cap = getattr(info, "vmem_capacity_bytes", None)
        if cap:
            return int(cap)
    except Exception:
        pass
    return 64 * 1024 * 1024  # v7x per-TC value (most restrictive generation)


_VMEM_CAP = _vmem_capacity_bytes()
# Per-block budget (sized against f32 intermediates): big enough to amortize
# the ~0.35us/step grid overhead even at 3.2 TB/s HBM, small enough that
# 2 in-buffers + 2 out-buffers fit under the scoped-VMEM limit below.
_BLOCK_BYTES = min(8 * 1024 * 1024, max(2 * 1024 * 1024, _VMEM_CAP // 8))
_VMEM_LIMIT_BYTES = min(_VMEM_CAP * 3 // 4, 4 * _BLOCK_BYTES + 16 * 1024 * 1024)


# ----------------------------------------------------------------------------
# Kernels
# ----------------------------------------------------------------------------
def _elementwise_kernel(x_ref, o_ref, *, activation):
    x = x_ref[...]
    if activation == "relu":
        # Stays in the input dtype (a max needs no upcast).
        y = jnp.maximum(x, 0)
    else:
        # bf16 stays packed (native bf16 VPU/EUP on v6e/v7x; the compiler
        # widens on v5e); every other dtype computes in f32.
        cdt = jnp.bfloat16 if x.dtype == jnp.bfloat16 else jnp.float32
        xf = x.astype(cdt)
        if activation == "sigmoid":
            # tanh identity: EUP transcendental + VPU mul/add, no VALU divide.
            y = 0.5 * jnp.tanh(0.5 * xf) + 0.5
        elif activation == "tanh":
            y = jnp.tanh(xf)
        else:
            raise ValueError(f"Unsupported elementwise activation: {activation}")
    o_ref[...] = y.astype(o_ref.dtype)


def _softmax_channel_kernel(x_ref, o_ref):
    # Block shape (tile_n, C, tile_hw): C on sublanes, H*W on lanes.
    x = x_ref[...].astype(jnp.float32)
    m = jnp.max(x, axis=1, keepdims=True)
    e = jnp.exp(x - m)
    denom = jnp.sum(e, axis=1, keepdims=True)
    inv = pl.reciprocal(denom, approx=True)  # EUP slot; ~free next to the exp
    o_ref[...] = (e * inv).astype(o_ref.dtype)


# ----------------------------------------------------------------------------
# Wrappers
# ----------------------------------------------------------------------------
def _choose_lane_width(total: int):
    """Largest lane-dense width (multiple of 128) that divides `total`."""
    cand = _MAX_LANE_WIDTH
    while cand >= _LANE:
        if total % cand == 0:
            return cand
        cand //= 2
    return None


def _pallas_elementwise(x, activation):
    """Applies relu/sigmoid/tanh to `x` (any shape) via a lane-dense 2-D view."""
    shape = x.shape
    total = int(x.size)
    flat = x.reshape(-1)

    # Lane-dense width K (multiple of 128).  If no such divisor exists, pad to
    # a multiple of 128 (and slice after) instead of emitting a ragged /
    # whole-tensor block.
    k = _choose_lane_width(total)
    padded_total = total
    if k is None:
        k = _LANE
        padded_total = pl.cdiv(total, k) * k
        flat = jnp.pad(flat, (0, padded_total - total))
    m = padded_total // k
    x2d = flat.reshape(m, k)

    # Row tile: as many rows as the block budget allows (budget measured in
    # f32 elements so transcendental intermediates are covered).
    budget_elems = max(_SUBLANE * k, _BLOCK_BYTES // 4)
    budget_rows = max(_SUBLANE, (budget_elems // k) // _SUBLANE * _SUBLANE)

    if m <= budget_rows:
        if m >= 2 * _SUBLANE:
            # Split into >=2 grid steps on a sublane boundary so v7x's second
            # TensorCore gets work (no effect on single-TC v5e/v6e).
            tile_rows = pl.cdiv(pl.cdiv(m, 2), _SUBLANE) * _SUBLANE
        else:
            tile_rows = m
    else:
        tile_rows = budget_rows
    tile_rows = min(tile_rows, m)
    grid = (pl.cdiv(m, tile_rows),)

    nbytes = total * x.dtype.itemsize
    transcendentals = total if activation in ("sigmoid", "tanh") else 0
    cost = pl.CostEstimate(
        flops=2 * total, transcendentals=transcendentals, bytes_accessed=2 * nbytes
    )

    kernel = functools.partial(_elementwise_kernel, activation=activation)
    y2d = pl.pallas_call(
        kernel,
        out_shape=jax.ShapeDtypeStruct((m, k), x.dtype),
        grid=grid,
        in_specs=[pl.BlockSpec((tile_rows, k), lambda i: (i, 0))],
        out_specs=pl.BlockSpec((tile_rows, k), lambda i: (i, 0)),
        compiler_params=pltpu.CompilerParams(
            dimension_semantics=("parallel",),
            vmem_limit_bytes=_VMEM_LIMIT_BYTES,
        ),
        cost_estimate=cost,
    )(x2d)

    y_flat = y2d.reshape(padded_total)
    if padded_total != total:
        y_flat = y_flat[:total]
    return y_flat.reshape(shape)


def _pallas_softmax_channels(x_nchw):
    """Softmax over dim=1 of an NCHW tensor without any transpose."""
    n, c, h, w = x_nchw.shape
    hw = h * w
    x3d = x_nchw.reshape(n, c, hw)

    # Pad the lane (H*W) axis to a multiple of 128 -> full-width stores.  The
    # padded columns are softmaxed independently and sliced off afterwards.
    hw_pad = pl.cdiv(hw, _LANE) * _LANE
    if hw_pad != hw:
        x3d = jnp.pad(x3d, ((0, 0), (0, 0), (0, hw_pad - hw)))

    # Lane tile: largest power-of-two multiple of 128 (<= cap) dividing hw_pad,
    # so every tile (including the last) is lane-dense.
    tile_hw = _LANE
    cand = _MAX_LANE_WIDTH
    while cand >= _LANE:
        if hw_pad % cand == 0:
            tile_hw = cand
            break
        cand //= 2

    # Fold batch rows into each block so the DMA granularity hits the block
    # budget instead of issuing one tiny transfer per (n, hw-tile).
    per_row_bytes = c * tile_hw * 4  # f32 intermediates in-kernel
    tile_n = max(1, min(n, _BLOCK_BYTES // per_row_bytes))
    if tile_n >= n and n > 1:
        tile_n = pl.cdiv(n, 2)  # keep >=2 grid steps for v7x's second core
    grid = (pl.cdiv(n, tile_n), hw_pad // tile_hw)

    nbytes = n * c * hw_pad * x_nchw.dtype.itemsize
    cost = pl.CostEstimate(
        flops=5 * n * c * hw_pad, transcendentals=n * c * hw_pad,
        bytes_accessed=2 * nbytes,
    )

    y3d = pl.pallas_call(
        _softmax_channel_kernel,
        out_shape=jax.ShapeDtypeStruct((n, c, hw_pad), x_nchw.dtype),
        grid=grid,
        in_specs=[pl.BlockSpec((tile_n, c, tile_hw), lambda i, j: (i, 0, j))],
        out_specs=pl.BlockSpec((tile_n, c, tile_hw), lambda i, j: (i, 0, j)),
        compiler_params=pltpu.CompilerParams(
            dimension_semantics=("parallel", "parallel"),
            vmem_limit_bytes=_VMEM_LIMIT_BYTES,
        ),
        cost_estimate=cost,
    )(x3d)

    if hw_pad != hw:
        y3d = y3d[:, :, :hw]
    return y3d.reshape(n, c, h, w)


# ----------------------------------------------------------------------------
# Thin JAX-side "Model" mirroring the PyTorch base class.
# ----------------------------------------------------------------------------
@dataclass
class Architecture:
    activation: str | None = None


class PallasModel:
    def __init__(self, arch: Architecture):
        self.arch = arch

    def get_activation(self):
        """Returns a callable applying the configured activation via Pallas."""
        act = self.arch.activation
        if act is None:
            return None
        if act in ("relu", "sigmoid", "tanh"):
            return functools.partial(_pallas_elementwise, activation=act)
        if act == "softmax":
            return _pallas_softmax_channels  # softmax over dim=1 (channels)
        raise ValueError(f"Unsupported activation function: {act}")

    def forward(self, x):
        # Base-class forward is abstract in the reference; the configured
        # activation is the representative compute path here.
        act = self.get_activation()
        return x if act is None else act(x)

    def size(self) -> int:
        return 0  # base class has no parameters

    # TODO(synk): save/load/compute (torch.save, torchprofile) have no Pallas
    #             equivalent and are intentionally not implemented.


# ----------------------------------------------------------------------------
# Reference (pure-JAX) activations for a quick correctness check.
# ----------------------------------------------------------------------------
def _ref_activation(x, activation):
    if activation is None:
        return x
    if activation == "relu":
        return jnp.maximum(x, 0.0)
    if activation == "sigmoid":
        return jax.nn.sigmoid(x)
    if activation == "tanh":
        return jnp.tanh(x)
    if activation == "softmax":
        return jax.nn.softmax(x, axis=1)  # dim=1 == channel axis (NCHW)
    raise ValueError(activation)


if __name__ == "__main__":
    key = jax.random.PRNGKey(0)
    # Small NCHW input consistent with the module's conventions.
    x = jax.random.normal(key, (2, 4, 16, 16), dtype=jnp.float32)

    tols = {None: 1e-6, "relu": 1e-6, "sigmoid": 1e-4, "tanh": 1e-4,
            "softmax": 5e-3}  # approx reciprocal in the softmax denominator

    ok = True
    for act_name in (None, "relu", "sigmoid", "tanh", "softmax"):
        model = PallasModel(Architecture(activation=act_name))
        y = jax.block_until_ready(model.forward(x))
        y_ref = _ref_activation(x, act_name)
        tol = tols[act_name]
        if y.shape != y_ref.shape or not jnp.allclose(y, y_ref, atol=tol, rtol=tol):
            ok = False
            print(f"MISMATCH for activation={act_name}")

    if ok:
        print("KERNEL_OK")
</pallas_src>

<mosaic_0001>
module attributes {stable_mosaic.version = 11 : i64} {
  func.func @_elementwise_kernel(%arg0: i32, %arg1: memref<1x2048xf32, #tpu.memory_space<vmem>>, %arg2: memref<1x2048xf32, #tpu.memory_space<vmem>>) attributes {dimension_semantics = [#tpu.dimension_semantics<parallel>], iteration_bounds = array<i64: 1>, scalar_prefetch = 0 : i64, scratch_operands = 0 : i64, tpu.core_type = #tpu.core_type<tc>, window_params = [{transform_indices = @transform_0, window_bounds = array<i64: 1, 2048>}, {transform_indices = @transform_1, window_bounds = array<i64: 1, 2048>}]} {
    %c0 = arith.constant 0 : index
    %c0_0 = arith.constant 0 : index
    %0 = vector.load %arg1[%c0, %c0_0] : memref<1x2048xf32, #tpu.memory_space<vmem>>, vector<1x2048xf32>
    %cst = arith.constant 0.000000e+00 : f32
    %1 = vector.broadcast %cst : f32 to vector<1x2048xf32>
    %2 = arith.maximumf %0, %1 : vector<1x2048xf32>
    %c0_1 = arith.constant 0 : index
    %c0_2 = arith.constant 0 : index
    %3 = vector.load %arg2[%c0_1, %c0_2] : memref<1x2048xf32, #tpu.memory_space<vmem>>, vector<1x2048xf32>
    tpu.vector_store %arg2[%c0_1, %c0_2], %2 {strides = array<i32>} : memref<1x2048xf32, #tpu.memory_space<vmem>>, vector<1x2048xf32>,
    return
  }
  func.func @transform_0(%arg0: i32) -> (i32, i32) {
    %c0_i32 = arith.constant 0 : i32
    %c0_i32_0 = arith.constant 0 : i32
    return %arg0, %c0_i32 : i32, i32
  }
  func.func @transform_1(%arg0: i32) -> (i32, i32) {
    %c0_i32 = arith.constant 0 : i32
    %c0_i32_0 = arith.constant 0 : i32
    return %arg0, %c0_i32 : i32, i32
  }
}

</mosaic_0001>

<bundles_post_ra>
// kernel: tpu_custom_call.1
= control target key start
LH: loop header
LB: loop body
LE: loop exit
PB: predicated region body
PF: predicated region fallthrough
CT: control target
= control target key end

     0   :  { %6 = vsyncpa [#allocation3], 0  ;;  %s106_s0 = inlined_call_operand.hbm [shape: f32[1,2048], index: 0, kind: input, shape index: {}]   ;;  %s107_s1 = inlined_call_operand.hbm [shape: f32[1,2048], index: 1, kind: output, shape index: {}]  }
   0x1   :  { %7 = vsyncpa [#allocation4], 0  ;;  %s88_s6 = smov [#allocation2]  }
   0x2   :  { %s14_s7 = sshll.u32 %s88_s6, 4  ;;  %s15_s7 = int_to_ptr.vmem [resolvable:$true] %s14_s7 }
   0x3   :  { %s52_s8 = scalar_lea.vmem %s15_s7, 256  ;;  %p57_p1 = scmp.lt.s32.totalorder %s15_s7, %s15_s7 }
   0x4   :  { %p53_p0 = scmp.ne.s32.totalorder %s15_s7, %s52_s8  ;;  %p58_p2 = scmp.lt.s32.totalorder %s52_s8, %s52_s8 }
   0x6   :  { %p59_p3 = por %p58_p2, %p57_p1 }
   0x8   :  { %p60_p4 = pnand %p59_p3, %p53_p0 }
   0xa   :  { %63 = shalt.err (!%p60_p4)
}
   0xb   :  { %17 = dma.hbm_to_vmem [thread:$0]  %s106_s0, 256, %s15_s7, [#allocation3]  }
   0xc   :  { %84 = dma.done.wait [#allocation3], 256  }
   0xd   :  { %85 = vsyncadd [#allocation3], 4294967040  ;;  %s89_s11 = smov [#allocation5]   ;;  %v21_v0 = vld [vmem:[#allocation2] sm:$0xff]  ;;  %v22_v1 = vld [vmem:[#allocation2 + $0x8] sm:$0xff] }
   0xe   :  { %s33_s12 = sshll.u32 %s89_s11, 4  ;;  %v23_v2 = vmax.f32 %v21_v0, 0.0  ;;  %v24_v3 = vmax.f32 %v22_v1, 0.0  ;;  %s34_s12 = int_to_ptr.vmem [resolvable:$true] %s33_s12 }
   0xf   :  { %s64_s13 = scalar_lea.vmem %s34_s12, 256  ;;  %p69_p6 = scmp.lt.s32.totalorder %s34_s12, %s34_s12 }
  0x10   :  { %25 = vst [vmem:[#allocation5] sm:$0xff] %v23_v2  ;;  %26 = vst [vmem:[#allocation5 + $0x8] sm:$0xff] %v24_v3  ;;  %p65_p5 = scmp.ne.s32.totalorder %s34_s12, %s64_s13  ;;  %p70_p7 = scmp.lt.s32.totalorder %s64_s13, %s64_s13 }
  0x12   :  { %p71_p8 = por %p70_p7, %p69_p6 }
  0x14   :  { %p72_p9 = pnand %p71_p8, %p65_p5 }
  0x16   :  { %75 = shalt.err (!%p72_p9)
}
  0x17   :  { %36 = dma.vmem_to_hbm [thread:$0]  %s34_s12, 256, %s107_s1, [#allocation4]  }
  0x18   :  { %86 = dma.done.wait [#allocation4], 256  }
  0x19   :  { %87 = vsyncadd [#allocation4], 4294967040 }
  0x1a   :  { %40 = vsyncpa [#allocation3], 1 }
  0x1b   :  { %41 = vsyncpa [#allocation4], 1 }

</bundles_post_ra>
